<compile_context>
chip_gen: v6e
topology: v6e:2x2x1
jax: 0.10.0
libtpu: 0.0.40
codegen_flags: <defaults>
</compile_context>

<pallas_src>
import functools

import jax
import jax.numpy as jnp
from jax.experimental import pallas as pl
from jax.experimental.pallas import tpu as pltpu


_LANE = 128  # last dim must stay a multiple of the 128-lane vreg width


def _round_up(n, m):
    return ((n + m - 1) // m) * m


def _cdiv(a, b):
    return (a + b - 1) // b


def _vmem_capacity_bytes():
    """Physical per-core VMEM; conservative fallback = v7x (64 MiB)."""
    try:
        info = pltpu.get_tpu_info()
        cap = getattr(info, "vmem_capacity_bytes", None)
        if cap:
            return int(cap)
    except Exception:
        pass
    return 64 * 1024 * 1024


def _finish_rows(rows, l2norm, out_dtype):
    """Optional per-row l2-normalization (accumulated in f32) + output cast."""
    if l2norm:
        r32 = rows.astype(jnp.float32)
        inv = jax.lax.rsqrt(jnp.sum(r32 * r32, axis=-1, keepdims=True) + 1e-12)
        rows = r32 * inv
    return rows.astype(out_dtype)


# ----------------------------------------------------------------------------
# Kernels
# ----------------------------------------------------------------------------
def _slice_pe_kernel(emb_ref, out_ref, *, l2norm):
    """pos=None (+l2norm) path: contiguous row-tile copy + normalize.

    emb_ref : (ts, D_pad) VMEM   (pre-scaled table rows)
    out_ref : (ts, D_pad) VMEM
    """
    out_ref[...] = _finish_rows(emb_ref[...], l2norm, out_ref.dtype)


def _gather_resident_kernel(pos_ref, emb_ref, out_ref, *, l2norm, tr):
    """Batched gather with the whole padded table resident in VMEM.

    pos_ref : (n_pad,) int32 SMEM (scalar prefetch)
    emb_ref : (rows_pad, D_pad) VMEM  -- constant block index => DMA'd once
    out_ref : (tr, D_pad) VMEM
    """
    base = pl.program_id(0) * tr
    for r in range(tr):                       # static unroll, tr in [8, 64]
        idx = pos_ref[base + r]
        row = emb_ref[pl.ds(idx, 1), :]       # dynamic-slice VMEM read
        out_ref[pl.ds(r, 1), :] = _finish_rows(row, l2norm, out_ref.dtype)


def _gather_hbm_kernel(pos_ref, emb_hbm, out_ref, buf, sem, *, l2norm, tr):
    """Batched gather with the table left in HBM (large-table fallback).

    Per grid step: TR row DMAs into a double-buffered VMEM scratch; the next
    block's DMAs are issued before waiting on the current one.

    pos_ref : (n_pad,) int32 SMEM (scalar prefetch)
    emb_hbm : (rows_pad, D_pad) HBM (memory_space=pl.ANY)
    out_ref : (tr, D_pad) VMEM
    buf     : (2, tr, D_pad) VMEM scratch
    sem     : (2, tr) DMA semaphores
    """
    i = pl.program_id(0)
    nblk = pl.num_programs(0)

    def start_fetch(blk, slot):
        base = blk * tr
        for r in range(tr):
            pltpu.make_async_copy(
                emb_hbm.at[pl.ds(pos_ref[base + r], 1)],
                buf.at[slot, pl.ds(r, 1)],
                sem.at[slot, r],
            ).start()

    @pl.when(i == 0)                 # prime the pipeline
    def _():
        start_fetch(0, 0)

    @pl.when(i + 1 < nblk)           # prefetch next block into the other slot
    def _():
        start_fetch(i + 1, (i + 1) % 2)

    slot = i % 2
    for r in range(tr):              # wait for the current block's row DMAs
        pltpu.make_async_copy(
            emb_hbm.at[pl.ds(0, 1)],
            buf.at[slot, pl.ds(r, 1)],
            sem.at[slot, r],
        ).wait()

    out_ref[...] = _finish_rows(buf[slot], l2norm, out_ref.dtype)


# ----------------------------------------------------------------------------
# Module wrapper
# ----------------------------------------------------------------------------
class BoringPositionalEncodingPallas:
    """JAX/Pallas port of BoringPositionalEncoding with the 'absolute' strategy."""

    def __init__(self, dim_model, max_seq_len, l2norm_embed=False, *, key,
                 dtype=jnp.float32, force_hbm_gather=False):
        self.dim_model = dim_model
        self.max_seq_len = max_seq_len
        self.l2norm_embed = l2norm_embed
        self.scale = 1.0 if l2norm_embed else dim_model ** -0.5
        self.dtype = jnp.dtype(dtype)
        self.force_hbm_gather = force_hbm_gather

        # sublane alignment: 8 rows for 32-bit, 16 for bf16 (packed vregs)
        self.row_align = max(8, 32 // self.dtype.itemsize)

        # nn.Embedding default init ~ N(0, 1); deterministic from the key.
        emb = jax.random.normal(key, (max_seq_len, dim_model), dtype=jnp.float32)
        self.emb = emb  # unscaled f32 copy, kept for reference checks

        # Pre-scale once; pad columns to a lane-dense D_pad and rows to a
        # sublane-aligned count.  Zero column padding is inert for l2norm.
        self.dim_pad = _round_up(max(dim_model, _LANE), _LANE)
        self.rows_pad = _round_up(max_seq_len, self.row_align)
        padded = jnp.zeros((self.rows_pad, self.dim_pad), self.dtype)
        self.emb_padded = padded.at[:max_seq_len, :dim_model].set(
            (emb * self.scale).astype(self.dtype))

        self._row_bytes = self.dim_pad * self.dtype.itemsize
        cap = _vmem_capacity_bytes()
        self._vmem_budget = int(cap * 0.45)   # headroom for Mosaic internals
        self._vmem_limit = int(cap * 0.60)

    # --- pos is None & l2norm: contiguous row-tile kernel ---------------------
    def _forward_arange(self, seq_len):
        # VMEM-budget-aware row tile: in + out, each double-buffered.
        ts = self._vmem_budget // (4 * self._row_bytes)
        ts = max(self.row_align, (min(ts, 2048) // self.row_align) * self.row_align)
        ts = min(ts, _round_up(seq_len, self.row_align))
        n_out = _round_up(seq_len, ts)
        if n_out > self.rows_pad:   # keep every row tile inside the padded table
            ts = self.row_align
            n_out = _round_up(seq_len, ts)
        grid = (n_out // ts,)
        kernel = functools.partial(_slice_pe_kernel, l2norm=self.l2norm_embed)
        return pl.pallas_call(
            kernel,
            out_shape=jax.ShapeDtypeStruct((n_out, self.dim_pad), self.dtype),
            grid=grid,
            in_specs=[pl.BlockSpec((ts, self.dim_pad), lambda i: (i, 0))],
            out_specs=pl.BlockSpec((ts, self.dim_pad), lambda i: (i, 0)),
            compiler_params=pltpu.CompilerParams(
                dimension_semantics=("parallel",),
                vmem_limit_bytes=self._vmem_limit),
        )(self.emb_padded)

    # --- explicit pos: batched gather (VMEM-resident or HBM row-DMA) ----------
    def _forward_gather(self, pos):
        n = pos.shape[0]
        # TR rows per grid step (>=8, sublane-aligned, <=64) amortizes the
        # per-step overhead and makes stores full (8,128)-tile transfers.
        tr = min(64, max(self.row_align,
                         _round_up(min(n, 64), self.row_align)))
        nblk = _cdiv(n, tr)
        n_pad = nblk * tr
        pos_padded = jnp.pad(pos, (0, n_pad - n))   # pad gathers row 0, discarded

        table_bytes = self.rows_pad * self._row_bytes
        blk_bytes = tr * self._row_bytes
        resident = (not self.force_hbm_gather) and (
            2 * table_bytes + 2 * blk_bytes <= self._vmem_budget)

        if resident:
            out = pl.pallas_call(
                functools.partial(_gather_resident_kernel,
                                  l2norm=self.l2norm_embed, tr=tr),
                out_shape=jax.ShapeDtypeStruct((n_pad, self.dim_pad), self.dtype),
                grid_spec=pltpu.PrefetchScalarGridSpec(
                    num_scalar_prefetch=1,
                    grid=(nblk,),
                    in_specs=[pl.BlockSpec((self.rows_pad, self.dim_pad),
                                           lambda i, p: (0, 0))],
                    out_specs=pl.BlockSpec((tr, self.dim_pad),
                                           lambda i, p: (i, 0))),
                compiler_params=pltpu.CompilerParams(
                    dimension_semantics=("parallel",),
                    vmem_limit_bytes=self._vmem_limit),
            )(pos_padded, self.emb_padded)
        else:
            out = pl.pallas_call(
                functools.partial(_gather_hbm_kernel,
                                  l2norm=self.l2norm_embed, tr=tr),
                out_shape=jax.ShapeDtypeStruct((n_pad, self.dim_pad), self.dtype),
                grid_spec=pltpu.PrefetchScalarGridSpec(
                    num_scalar_prefetch=1,
                    grid=(nblk,),
                    in_specs=[pl.BlockSpec(memory_space=pl.ANY)],
                    out_specs=pl.BlockSpec((tr, self.dim_pad),
                                           lambda i, p: (i, 0)),
                    scratch_shapes=[
                        pltpu.VMEM((2, tr, self.dim_pad), self.dtype),
                        pltpu.SemaphoreType.DMA((2, tr))]),
                compiler_params=pltpu.CompilerParams(
                    dimension_semantics=("arbitrary",),   # manual pipeline prime
                    vmem_limit_bytes=self._vmem_limit),
            )(pos_padded, self.emb_padded)
        return out

    def __call__(self, x, pos=None):
        # x: [batch, seq, dim]; only seq_len is consumed (matches the torch module).
        seq_len = x.shape[1]
        assert seq_len <= self.max_seq_len, (
            f"Sequence length {seq_len} exceeds maximum {self.max_seq_len}")
        if pos is None:
            if not self.l2norm_embed:
                # Pure copy of pre-scaled rows: skip the kernel launch entirely.
                return self.emb_padded[:seq_len, :self.dim_model]
            out, n = self._forward_arange(seq_len), seq_len
        else:
            pos = jnp.asarray(pos, jnp.int32).reshape(-1)
            # Clamp OOB indices: TPU gathers have no runtime bounds check.
            pos = jnp.clip(pos, 0, self.max_seq_len - 1)
            out, n = self._forward_gather(pos), pos.shape[0]
        return out[:n, :self.dim_model]


if __name__ == "__main__":
    key = jax.random.PRNGKey(0)
    k_emb, k_x = jax.random.split(key)

    batch, seq_len, dim_model, max_seq_len = 2, 8, 32, 64

    module = BoringPositionalEncodingPallas(
        dim_model=dim_model, max_seq_len=max_seq_len, l2norm_embed=False, key=k_emb)
    x = jax.random.normal(k_x, (batch, seq_len, dim_model), dtype=jnp.float32)

    # 1) default pos = arange(seq_len), no l2norm -> kernel-free slice fast path
    pe = jax.block_until_ready(module(x))
    ref = module.emb[jnp.arange(seq_len)] * module.scale
    assert pe.shape == (seq_len, dim_model)
    assert jnp.allclose(pe, ref, atol=1e-5, rtol=1e-5)

    # 2) explicit permuted pos -> batched VMEM-resident gather kernel
    pos = jnp.array([7, 3, 0, 5, 2, 6, 1, 4], dtype=jnp.int32)
    pe_g = jax.block_until_ready(module(x, pos))
    ref_g = module.emb[pos] * module.scale
    assert pe_g.shape == (seq_len, dim_model)
    assert jnp.allclose(pe_g, ref_g, atol=1e-5, rtol=1e-5)

    # 3) forced HBM manual-DMA gather (the large-table fallback path)
    module_hbm = BoringPositionalEncodingPallas(
        dim_model=dim_model, max_seq_len=max_seq_len, l2norm_embed=False,
        key=k_emb, force_hbm_gather=True)
    pe_h = jax.block_until_ready(module_hbm(x, pos))
    assert jnp.allclose(pe_h, ref_g, atol=1e-5, rtol=1e-5)

    # 4) l2norm_embed variant, default pos -> arange Pallas kernel (EUP rsqrt)
    module_l2 = BoringPositionalEncodingPallas(
        dim_model=dim_model, max_seq_len=max_seq_len, l2norm_embed=True, key=k_emb)
    pe_l2 = jax.block_until_ready(module_l2(x))
    rows = module_l2.emb[jnp.arange(seq_len)]
    ref_l2 = rows * jax.lax.rsqrt(jnp.sum(rows * rows, axis=-1, keepdims=True) + 1e-12)
    assert jnp.allclose(pe_l2, ref_l2, atol=1e-5, rtol=1e-5)

    # 5) bf16 table variant (halves bytes moved); l2norm math stays f32 in-kernel
    module_bf = BoringPositionalEncodingPallas(
        dim_model=dim_model, max_seq_len=max_seq_len, l2norm_embed=True,
        key=k_emb, dtype=jnp.bfloat16)
    x16 = jax.random.normal(k_x, (batch, 16, dim_model), dtype=jnp.float32)
    pe_bf = jax.block_until_ready(module_bf(x16))
    rows_bf = module_bf.emb_padded[:16, :dim_model].astype(jnp.float32)
    ref_bf = rows_bf * jax.lax.rsqrt(
        jnp.sum(rows_bf * rows_bf, axis=-1, keepdims=True) + 1e-12)
    assert pe_bf.dtype == jnp.bfloat16
    assert jnp.allclose(pe_bf.astype(jnp.float32), ref_bf, atol=2e-2)

    print("KERNEL_OK")
</pallas_src>

<mosaic_0001>
module attributes {stable_mosaic.version = 11 : i64} {
  func.func @_gather_resident_kernel(%arg0: i32, %arg1: memref<8xi32, #tpu.memory_space<smem>>, %arg2: memref<64x128xf32, #tpu.memory_space<vmem>>, %arg3: memref<8x128xf32, #tpu.memory_space<vmem>>) attributes {dimension_semantics = [#tpu.dimension_semantics<parallel>], iteration_bounds = array<i64: 1>, scalar_prefetch = 1 : i64, scratch_operands = 0 : i64, tpu.core_type = #tpu.core_type<tc>, window_params = [{pipeline_mode = #tpu.pipeline_mode<synchronous>, transform_indices = @transform_0, window_bounds = array<i64: 64, 128>}, {transform_indices = @transform_1, window_bounds = array<i64: 8, 128>}]} {
    %c8_i32 = arith.constant 8 : i32
    %0 = arith.muli %arg0, %c8_i32 : i32
    %c0_i32 = arith.constant 0 : i32
    %1 = arith.addi %0, %c0_i32 : i32
    %2 = arith.index_cast %1 : i32 to index
    %3 = memref.load %arg1[%2] : memref<8xi32, #tpu.memory_space<smem>>
    %4 = arith.index_cast %3 : i32 to index
    %c0 = arith.constant 0 : index
    %5 = vector.load %arg2[%4, %c0] : memref<64x128xf32, #tpu.memory_space<vmem>>, vector<1x128xf32>
    %c0_0 = arith.constant 0 : index
    %c0_1 = arith.constant 0 : index
    %6 = vector.load %arg3[%c0_0, %c0_1] : memref<8x128xf32, #tpu.memory_space<vmem>>, vector<1x128xf32>
    tpu.vector_store %arg3[%c0_0, %c0_1], %5 {strides = array<i32>} : memref<8x128xf32, #tpu.memory_space<vmem>>, vector<1x128xf32>,
    %c1_i32 = arith.constant 1 : i32
    %7 = arith.addi %0, %c1_i32 : i32
    %8 = arith.index_cast %7 : i32 to index
    %9 = memref.load %arg1[%8] : memref<8xi32, #tpu.memory_space<smem>>
    %10 = arith.index_cast %9 : i32 to index
    %c0_2 = arith.constant 0 : index
    %11 = vector.load %arg2[%10, %c0_2] : memref<64x128xf32, #tpu.memory_space<vmem>>, vector<1x128xf32>
    %c1 = arith.constant 1 : index
    %c0_3 = arith.constant 0 : index
    %12 = vector.load %arg3[%c1, %c0_3] : memref<8x128xf32, #tpu.memory_space<vmem>>, vector<1x128xf32>
    tpu.vector_store %arg3[%c1, %c0_3], %11 {strides = array<i32>} : memref<8x128xf32, #tpu.memory_space<vmem>>, vector<1x128xf32>,
    %c2_i32 = arith.constant 2 : i32
    %13 = arith.addi %0, %c2_i32 : i32
    %14 = arith.index_cast %13 : i32 to index
    %15 = memref.load %arg1[%14] : memref<8xi32, #tpu.memory_space<smem>>
    %16 = arith.index_cast %15 : i32 to index
    %c0_4 = arith.constant 0 : index
    %17 = vector.load %arg2[%16, %c0_4] : memref<64x128xf32, #tpu.memory_space<vmem>>, vector<1x128xf32>
    %c2 = arith.constant 2 : index
    %c0_5 = arith.constant 0 : index
    %18 = vector.load %arg3[%c2, %c0_5] : memref<8x128xf32, #tpu.memory_space<vmem>>, vector<1x128xf32>
    tpu.vector_store %arg3[%c2, %c0_5], %17 {strides = array<i32>} : memref<8x128xf32, #tpu.memory_space<vmem>>, vector<1x128xf32>,
    %c3_i32 = arith.constant 3 : i32
    %19 = arith.addi %0, %c3_i32 : i32
    %20 = arith.index_cast %19 : i32 to index
    %21 = memref.load %arg1[%20] : memref<8xi32, #tpu.memory_space<smem>>
    %22 = arith.index_cast %21 : i32 to index
    %c0_6 = arith.constant 0 : index
    %23 = vector.load %arg2[%22, %c0_6] : memref<64x128xf32, #tpu.memory_space<vmem>>, vector<1x128xf32>
    %c3 = arith.constant 3 : index
    %c0_7 = arith.constant 0 : index
    %24 = vector.load %arg3[%c3, %c0_7] : memref<8x128xf32, #tpu.memory_space<vmem>>, vector<1x128xf32>
    tpu.vector_store %arg3[%c3, %c0_7], %23 {strides = array<i32>} : memref<8x128xf32, #tpu.memory_space<vmem>>, vector<1x128xf32>,
    %c4_i32 = arith.constant 4 : i32
    %25 = arith.addi %0, %c4_i32 : i32
    %26 = arith.index_cast %25 : i32 to index
    %27 = memref.load %arg1[%26] : memref<8xi32, #tpu.memory_space<smem>>
    %28 = arith.index_cast %27 : i32 to index
    %c0_8 = arith.constant 0 : index
    %29 = vector.load %arg2[%28, %c0_8] : memref<64x128xf32, #tpu.memory_space<vmem>>, vector<1x128xf32>
    %c4 = arith.constant 4 : index
    %c0_9 = arith.constant 0 : index
    %30 = vector.load %arg3[%c4, %c0_9] : memref<8x128xf32, #tpu.memory_space<vmem>>, vector<1x128xf32>
    tpu.vector_store %arg3[%c4, %c0_9], %29 {strides = array<i32>} : memref<8x128xf32, #tpu.memory_space<vmem>>, vector<1x128xf32>,
    %c5_i32 = arith.constant 5 : i32
    %31 = arith.addi %0, %c5_i32 : i32
    %32 = arith.index_cast %31 : i32 to index
    %33 = memref.load %arg1[%32] : memref<8xi32, #tpu.memory_space<smem>>
    %34 = arith.index_cast %33 : i32 to index
    %c0_10 = arith.constant 0 : index
    %35 = vector.load %arg2[%34, %c0_10] : memref<64x128xf32, #tpu.memory_space<vmem>>, vector<1x128xf32>
    %c5 = arith.constant 5 : index
    %c0_11 = arith.constant 0 : index
    %36 = vector.load %arg3[%c5, %c0_11] : memref<8x128xf32, #tpu.memory_space<vmem>>, vector<1x128xf32>
    tpu.vector_store %arg3[%c5, %c0_11], %35 {strides = array<i32>} : memref<8x128xf32, #tpu.memory_space<vmem>>, vector<1x128xf32>,
    %c6_i32 = arith.constant 6 : i32
    %37 = arith.addi %0, %c6_i32 : i32
    %38 = arith.index_cast %37 : i32 to index
    %39 = memref.load %arg1[%38] : memref<8xi32, #tpu.memory_space<smem>>
    %40 = arith.index_cast %39 : i32 to index
    %c0_12 = arith.constant 0 : index
    %41 = vector.load %arg2[%40, %c0_12] : memref<64x128xf32, #tpu.memory_space<vmem>>, vector<1x128xf32>
    %c6 = arith.constant 6 : index
    %c0_13 = arith.constant 0 : index
    %42 = vector.load %arg3[%c6, %c0_13] : memref<8x128xf32, #tpu.memory_space<vmem>>, vector<1x128xf32>
    tpu.vector_store %arg3[%c6, %c0_13], %41 {strides = array<i32>} : memref<8x128xf32, #tpu.memory_space<vmem>>, vector<1x128xf32>,
    %c7_i32 = arith.constant 7 : i32
    %43 = arith.addi %0, %c7_i32 : i32
    %44 = arith.index_cast %43 : i32 to index
    %45 = memref.load %arg1[%44] : memref<8xi32, #tpu.memory_space<smem>>
    %46 = arith.index_cast %45 : i32 to index
    %c0_14 = arith.constant 0 : index
    %47 = vector.load %arg2[%46, %c0_14] : memref<64x128xf32, #tpu.memory_space<vmem>>, vector<1x128xf32>
    %c7 = arith.constant 7 : index
    %c0_15 = arith.constant 0 : index
    %48 = vector.load %arg3[%c7, %c0_15] : memref<8x128xf32, #tpu.memory_space<vmem>>, vector<1x128xf32>
    tpu.vector_store %arg3[%c7, %c0_15], %47 {strides = array<i32>} : memref<8x128xf32, #tpu.memory_space<vmem>>, vector<1x128xf32>,
    return
  }
  func.func @transform_0(%arg0: i32, %arg1: memref<8xi32, #tpu.memory_space<smem>>) -> (i32, i32) {
    %c0_i32 = arith.constant 0 : i32
    %c0_i32_0 = arith.constant 0 : i32
    %c0_i32_1 = arith.constant 0 : i32
    return %c0_i32, %c0_i32_0 : i32, i32
  }
  func.func @transform_1(%arg0: i32, %arg1: memref<8xi32, #tpu.memory_space<smem>>) -> (i32, i32) {
    %c0_i32 = arith.constant 0 : i32
    %c0_i32_0 = arith.constant 0 : i32
    return %arg0, %c0_i32 : i32, i32
  }
}

</mosaic_0001>

<bundles_post_ra>
// kernel: tpu_custom_call.1
= control target key start
LH: loop header
LB: loop body
LE: loop exit
PB: predicated region body
PF: predicated region fallthrough
CT: control target
= control target key end

     0   :  { %s157_s9 = smov [#allocation3]   ;;  %s186_s0 = inlined_call_operand.hbm [shape: s32[8], index: 0, kind: input, shape index: {}]   ;;  %s187_s1 = inlined_call_operand.hbm [shape: f32[64,128], index: 1, kind: input, shape index: {}]   ;;  %s188_s2 = inlined_call_operand.hbm [shape: f32[8,128], index: 2, kind: output, shape index: {}]  }
   0x1   :  { %8 = dma.hbm_to_smem %s186_s0, 16, %s157_s9, [#allocation2] }
   0x2   :  { %151 = dma.done.wait [#allocation2], 16 }
   0x3   :  { %152 = vsyncadd [#allocation2], 4294967280 }
   0x4   :  { %10 = sfence }
   0x5   :  { %11 = vsyncpa [#allocation5], 0 }
   0x6   :  { %12 = vsyncpa [#allocation6], 0  ;;  %s158_s12 = smov [#allocation4]  }
   0x7   :  { %s18_s13 = sshll.u32 %s158_s12, 4  ;;  %s19_s13 = int_to_ptr.vmem [resolvable:$true] %s18_s13 }
   0x8   :  { %s119_s14 = scalar_lea.vmem %s19_s13, 1024  ;;  %p124_p1 = scmp.lt.s32.totalorder %s19_s13, %s19_s13 }
   0x9   :  { %p120_p0 = scmp.ne.s32.totalorder %s19_s13, %s119_s14  ;;  %p125_p2 = scmp.lt.s32.totalorder %s119_s14, %s119_s14 }
   0xb   :  { %p126_p3 = por %p125_p2, %p124_p1 }
   0xd   :  { %p127_p4 = pnand %p126_p3, %p120_p0 }
   0xf   :  { %130 = shalt.err (!%p127_p4)
}
  0x10   :  { %s159_s15 = smov 128   ;;  %s160_s16 = smov 8  }
  0x11   :  { %24 = dma.hbm_to_vmem [thread:$0]  %s187_s1, 1024, %s19_s13, [#allocation5], %s159_s15, %s159_s15, %s160_s16  }
  0x12   :  { %153 = dma.done.wait [#allocation5], 1024  }
  0x13   :  { %154 = vsyncadd [#allocation5], 4294966272  ;;  %s29_s0 = sld [smem:[#allocation3]]  ;;  %s161_s29 = smov [#allocation7]  }
  0x14   :  { %s91_s19 = sld [smem:[#allocation3 + $0x1]]  ;;  %s74_s30 = sshll.u32 %s161_s29, 4  ;;  %s75_s30 = int_to_ptr.vmem [resolvable:$true] %s74_s30 }
  0x15   :  { %s92_s20 = sld [smem:[#allocation3 + $0x2]]  ;;  %s131_s7 = scalar_lea.vmem %s75_s30, 128 }
  0x16   :  { %s93_s21 = sld [smem:[#allocation3 + $0x3]]  ;;  %p132_p5 = scmp.ne.s32.totalorder %s75_s30, %s131_s7 }
  0x17   :  { %s94_s22 = sld [smem:[#allocation3 + $0x4]]  ;;  %p136_p6 = scmp.lt.s32.totalorder %s75_s30, %s75_s30 }
  0x18   :  { %s95_s23 = sld [smem:[#allocation3 + $0x5]]  ;;  %p137_p7 = scmp.lt.s32.totalorder %s131_s7, %s131_s7 }
  0x19   :  { %s96_s24 = sld [smem:[#allocation3 + $0x6]]  ;;  %s30_s25 = scalar_lea.vmem [#allocation4], %s29_s0 }
  0x1a   :  { %v31_v0 = vld [vmem:[%s30_s25] sm:$0x1]  ;;  %s97_s26 = sld [smem:[#allocation3 + $0x7]]  ;;  %s35_s27 = scalar_lea.vmem [#allocation4], %s91_s19 }
  0x1b   :  { %32 = vst [vmem:[#allocation7] sm:$0x1] %v31_v0  ;;  %v36_v1 = vld [vmem:[%s35_s27] sm:$0x1]  ;;  %s40_s28 = scalar_lea.vmem [#allocation4], %s92_s20  ;;  %p138_p8 = por %p137_p7, %p136_p6 }
  0x1c   :  { %37 = vst [vmem:[#allocation7 + $0x1] sm:$0x1] %v36_v1  ;;  %v41_v2 = vld [vmem:[%s40_s28] sm:$0x1]  ;;  %s45_s1 = scalar_lea.vmem [#allocation4], %s93_s21 }
  0x1d   :  { %42 = vst [vmem:[#allocation7 + $0x2] sm:$0x1] %v41_v2  ;;  %v46_v3 = vld [vmem:[%s45_s1] sm:$0x1]  ;;  %s50_s3 = scalar_lea.vmem [#allocation4], %s94_s22  ;;  %p139_p9 = pnand %p138_p8, %p132_p5 }
  0x1e   :  { %47 = vst [vmem:[#allocation7 + $0x3] sm:$0x1] %v46_v3  ;;  %v51_v4 = vld [vmem:[%s50_s3] sm:$0x1]  ;;  %s55_s4 = scalar_lea.vmem [#allocation4], %s95_s23 }
  0x1f   :  { %52 = vst [vmem:[#allocation7 + $0x4] sm:$0x1] %v51_v4  ;;  %v56_v5 = vld [vmem:[%s55_s4] sm:$0x1]  ;;  %s60_s5 = scalar_lea.vmem [#allocation4], %s96_s24 }
  0x20   :  { %57 = vst [vmem:[#allocation7 + $0x5] sm:$0x1] %v56_v5  ;;  %v61_v6 = vld [vmem:[%s60_s5] sm:$0x1]  ;;  %s65_s6 = scalar_lea.vmem [#allocation4], %s97_s26 }
  0x21   :  { %62 = vst [vmem:[#allocation7 + $0x6] sm:$0x1] %v61_v6  ;;  %v66_v7 = vld [vmem:[%s65_s6] sm:$0x1] }
  0x22   :  { %67 = vst [vmem:[#allocation7 + $0x7] sm:$0x1] %v66_v7 }
  0x23   :  { %142 = shalt.err (!%p139_p9)
}
  0x24   :  { %77 = dma.vmem_to_hbm [thread:$0]  %s75_s30, 128, %s188_s2, [#allocation6]  }
  0x25   :  { %155 = dma.done.wait [#allocation6], 128  }
  0x26   :  { %156 = vsyncadd [#allocation6], 4294967168 }
  0x27   :  { %81 = vsyncpa [#allocation5], 1 }
  0x28   :  { %82 = vsyncpa [#allocation6], 1 }

</bundles_post_ra>
